<compile_context>
chip_gen: v6e
topology: v6e:2x2x1
jax: 0.10.0
libtpu: 0.0.40
codegen_flags: <defaults>
</compile_context>

<pallas_src>
import math
import functools

import jax
import jax.numpy as jnp
from jax.experimental import pallas as pl
from jax.experimental.pallas import tpu as pltpu

D_MODEL = 128  # matches `d_model = 128` in the reference file


def _pe_add_kernel(seed_ref, pe_ref, x_ref, o_ref, *, p, training, compute_dtype):
    # pe_ref: (TS, D) in compute_dtype     x_ref / o_ref: (TB, TS, D)
    y = x_ref[...].astype(compute_dtype) + pe_ref[...][None, :, :]

    if training and p >= 1.0:
        # nn.Dropout(p=1.0) zeroes everything; guard avoids 1/(1-p) div-by-zero.
        y = jnp.zeros_like(y)
    elif training and p > 0.0:
        # Inverted dropout with the TPU-native hardware PRNG.
        # NOTE: on a partial last seq tile the RNG/compute also runs on padded
        # rows that are never stored back -- intentional and harmless.
        # TODO(synk): RNG stream is TPU-native (pltpu.prng_*), not bit-identical to
        # torch's nn.Dropout mask; it also has no CPU/interpret lowering, so the
        # demo only exercises this branch on a real TPU backend.
        s = pl.program_id(0)
        b = pl.program_id(1)
        pltpu.prng_seed(seed_ref[0] + s * pl.num_programs(1) + b)  # unique per grid cell
        bits = pltpu.prng_random_bits(y.shape)
        if bits.dtype != jnp.int32:
            bits = pltpu.bitcast(bits, jnp.int32)
        # Uniform int32 bits: P(bits >= t) == 1 - p  for  t = p*2^32 - 2^31.
        # (single compare, no masking / shifting / float convert per element)
        t = int(round(p * 4294967296.0)) - 2147483648
        t = max(-2147483648, min(2147483647, t))
        keep = bits >= jnp.int32(t)
        scale = jnp.asarray(1.0 / (1.0 - p), compute_dtype)
        y = jnp.where(keep, y * scale, jnp.zeros_like(y))

    o_ref[...] = y.astype(o_ref.dtype)


def _build_pe(S, D, dtype):
    """Positional-encoding table (S, D), identical to the PyTorch buffer (sliced to S)."""
    pos = jnp.arange(S, dtype=jnp.float32)[:, None]                       # (S, 1)
    div = jnp.exp(jnp.arange(0, D, 2, dtype=jnp.float32) *
                  (-math.log(10000.0) / D))                               # (D/2,)
    angle = pos * div                                                     # (S, D/2)
    # interleave: even cols = sin, odd cols = cos
    pe = jnp.stack([jnp.sin(angle), jnp.cos(angle)], axis=-1).reshape(S, D)
    return pe.astype(dtype)


def _device_kind():
    try:
        return jax.devices()[0].device_kind.lower()
    except Exception:
        return ""


def _target_block_bytes(dk):
    # Per-step block target, sized to fit 2x(in)+2x(out)+2x(pe) double-buffers
    # inside each generation's DEFAULT scoped-VMEM limit (no vmem_limit_bytes).
    if "v6" in dk:
        return 4 << 20      # v6e: 1.4 TB/s HBM, 32 MiB default scoped VMEM
    if "v7" in dk or "7x" in dk:
        return 6 << 20      # v7x: 3.2 TB/s HBM; 4x6 MiB + pe < 32 MiB default scoped
    return 2 << 20          # v5e / older / unknown: safe for a 16 MiB scoped limit


def _choose_tiles(B, S, D, itemsize, dk, seq_tile, batch_tile):
    target = _target_block_bytes(dk)
    sub = 16 if itemsize == 2 else 8   # sublane multiple: 16 for bf16, 8 for f32

    # --- sequence tile ---
    if seq_tile is not None:
        TS = min(S, int(seq_tile))
        assert TS == S or TS % sub == 0, "seq_tile must be a multiple of 8 (16 for bf16)"
    else:
        max_ts = max(16, target // (D * itemsize))
        TS = S if S <= max_ts else (max_ts // 16) * 16   # mult of 16: ok for f32 & bf16

    # --- batch tile: fill the block up to the per-step byte target ---
    if batch_tile is not None:
        TB = max(1, min(B, int(batch_tile)))
    else:
        TB = max(1, min(B, target // (TS * D * itemsize)))
        while TB > 1 and B % TB:     # keep batch blocks evenly sized (no padded blocks)
            TB -= 1

    # --- v7x megacore: never leave one of the two TensorCores idle ---
    two_cores = ("v7" in dk) or ("7x" in dk)
    if two_cores and pl.cdiv(S, TS) * pl.cdiv(B, TB) < 2 and B >= 2:
        TB = pl.cdiv(B, 2)           # give each core one batch block
    return TB, TS


def positional_encoding(x, *, dropout_p=0.1, training=False, seed=0,
                        seq_tile=None, batch_tile=None):
    """x: (B, S, D) float array. Returns x + PE (with optional inverted dropout)."""
    B, S, D = x.shape
    dk = _device_kind()

    # bf16 math only where the VPU has bf16 lanes (v6e / v7x); f32 elsewhere.
    use_bf16 = (x.dtype == jnp.bfloat16) and (("v6" in dk) or ("v7" in dk) or ("7x" in dk))
    compute_dtype = jnp.bfloat16 if use_bf16 else jnp.float32

    pe = _build_pe(S, D, compute_dtype)        # built once outside the kernel
    TB, TS = _choose_tiles(B, S, D, x.dtype.itemsize, dk, seq_tile, batch_tile)
    num_seq_tiles = pl.cdiv(S, TS)
    num_batch_tiles = pl.cdiv(B, TB)

    kernel = functools.partial(_pe_add_kernel, p=float(dropout_p),
                               training=bool(training), compute_dtype=compute_dtype)

    grid_spec = pltpu.PrefetchScalarGridSpec(
        num_scalar_prefetch=1,                           # dropout seed lands in SMEM
        grid=(num_seq_tiles, num_batch_tiles),           # seq outer, batch inner -> PE reuse
        in_specs=[
            pl.BlockSpec((TS, D), lambda s, b, seed_ref: (s, 0)),          # pe (batch-invariant)
            pl.BlockSpec((TB, TS, D), lambda s, b, seed_ref: (b, s, 0)),   # x
        ],
        out_specs=pl.BlockSpec((TB, TS, D), lambda s, b, seed_ref: (b, s, 0)),
    )

    return pl.pallas_call(
        kernel,
        out_shape=jax.ShapeDtypeStruct((B, S, D), x.dtype),
        grid_spec=grid_spec,
        compiler_params=pltpu.CompilerParams(
            dimension_semantics=("parallel", "parallel")),   # v7x megacore-friendly
    )(jnp.asarray([seed], jnp.int32), pe, x)


def _reference(x):
    B, S, D = x.shape
    pos = jnp.arange(S, dtype=jnp.float32)[:, None]
    div_term = jnp.exp(jnp.arange(0, D, 2, dtype=jnp.float32) * (-math.log(10000.0) / D))
    pe = jnp.zeros((S, D), jnp.float32)
    pe = pe.at[:, 0::2].set(jnp.sin(pos * div_term))
    pe = pe.at[:, 1::2].set(jnp.cos(pos * div_term))
    return x + pe[None, :, :]


if __name__ == "__main__":
    key = jax.random.PRNGKey(0)

    # Case 1: single block covers everything (B=2, S=8), eval mode, f32.
    B, S, D = 2, 8, D_MODEL
    x = jax.random.normal(key, (B, S, D), dtype=jnp.float32)
    y = jax.block_until_ready(positional_encoding(x, dropout_p=0.1, training=False))
    ref = _reference(x)
    assert jnp.allclose(y, ref, atol=1e-5), float(jnp.max(jnp.abs(y - ref)))

    # Case 2: force the multi-tile grid path (2 seq tiles x 2 batch tiles) to
    # exercise batch blocking and PE reuse across the inner batch loop.
    B2, S2 = 2, 16
    x2 = jax.random.normal(jax.random.PRNGKey(1), (B2, S2, D), dtype=jnp.float32)
    y2 = jax.block_until_ready(
        positional_encoding(x2, dropout_p=0.1, training=False, seq_tile=8, batch_tile=1))
    ref2 = _reference(x2)
    assert jnp.allclose(y2, ref2, atol=1e-5), float(jnp.max(jnp.abs(y2 - ref2)))

    # Case 3: bf16 input (bf16 math on v6e/v7x, f32 elsewhere) -- loose tolerance.
    xb = x2.astype(jnp.bfloat16)
    yb = jax.block_until_ready(positional_encoding(xb, dropout_p=0.1, training=False))
    assert yb.dtype == jnp.bfloat16
    assert jnp.allclose(yb.astype(jnp.float32),
                        _reference(xb.astype(jnp.float32)), atol=0.08, rtol=0.05)

    # Case 4: in-kernel dropout path. The TPU hardware PRNG primitives have no
    # CPU/interpret lowering, so only exercise this on a real TPU backend.
    if jax.devices()[0].platform == "tpu":
        yt = jax.block_until_ready(
            positional_encoding(x2, dropout_p=0.1, training=True, seed=123,
                                seq_tile=8, batch_tile=1))
        assert yt.shape == x2.shape
        # kept elements equal ref * 1/(1-p); dropped elements are exactly 0
        kept = yt != 0.0
        assert jnp.allclose(jnp.where(kept, yt, 0.0),
                            jnp.where(kept, ref2 / 0.9, 0.0), atol=1e-4)

    print("KERNEL_OK")
</pallas_src>

<mosaic_0001>
module attributes {stable_mosaic.version = 11 : i64} {
  func.func @_pe_add_kernel(%arg0: i32, %arg1: i32, %arg2: memref<1xi32, #tpu.memory_space<smem>>, %arg3: memref<8x128xf32, #tpu.memory_space<vmem>>, %arg4: memref<2x8x128xf32, #tpu.memory_space<vmem>>, %arg5: memref<2x8x128xf32, #tpu.memory_space<vmem>>) attributes {dimension_semantics = [#tpu.dimension_semantics<parallel>, #tpu.dimension_semantics<parallel>], iteration_bounds = array<i64: 1, 1>, scalar_prefetch = 1 : i64, scratch_operands = 0 : i64, tpu.core_type = #tpu.core_type<tc>, window_params = [{transform_indices = @transform_0, window_bounds = array<i64: 8, 128>}, {transform_indices = @transform_1, window_bounds = array<i64: 2, 8, 128>}, {transform_indices = @transform_2, window_bounds = array<i64: 2, 8, 128>}]} {
    %c0 = arith.constant 0 : index
    %c0_0 = arith.constant 0 : index
    %c0_1 = arith.constant 0 : index
    %0 = vector.load %arg4[%c0, %c0_0, %c0_1] : memref<2x8x128xf32, #tpu.memory_space<vmem>>, vector<2x8x128xf32>
    %c0_2 = arith.constant 0 : index
    %c0_3 = arith.constant 0 : index
    %1 = vector.load %arg3[%c0_2, %c0_3] : memref<8x128xf32, #tpu.memory_space<vmem>>, vector<8x128xf32>
    %2 = vector.shape_cast %1 : vector<8x128xf32> to vector<1x8x128xf32>
    %3 = vector.broadcast %2 : vector<1x8x128xf32> to vector<2x8x128xf32>
    %4 = arith.addf %0, %3 : vector<2x8x128xf32>
    %c0_4 = arith.constant 0 : index
    %c0_5 = arith.constant 0 : index
    %c0_6 = arith.constant 0 : index
    %5 = vector.load %arg5[%c0_4, %c0_5, %c0_6] : memref<2x8x128xf32, #tpu.memory_space<vmem>>, vector<2x8x128xf32>
    tpu.vector_store %arg5[%c0_4, %c0_5, %c0_6], %4 {strides = array<i32>} : memref<2x8x128xf32, #tpu.memory_space<vmem>>, vector<2x8x128xf32>,
    return
  }
  func.func @transform_0(%arg0: i32, %arg1: i32, %arg2: memref<1xi32, #tpu.memory_space<smem>>) -> (i32, i32) {
    %c0_i32 = arith.constant 0 : i32
    %c0_i32_0 = arith.constant 0 : i32
    return %arg0, %c0_i32 : i32, i32
  }
  func.func @transform_1(%arg0: i32, %arg1: i32, %arg2: memref<1xi32, #tpu.memory_space<smem>>) -> (i32, i32, i32) {
    %c0_i32 = arith.constant 0 : i32
    %c0_i32_0 = arith.constant 0 : i32
    return %arg1, %arg0, %c0_i32 : i32, i32, i32
  }
  func.func @transform_2(%arg0: i32, %arg1: i32, %arg2: memref<1xi32, #tpu.memory_space<smem>>) -> (i32, i32, i32) {
    %c0_i32 = arith.constant 0 : i32
    %c0_i32_0 = arith.constant 0 : i32
    return %arg1, %arg0, %c0_i32 : i32, i32, i32
  }
}

</mosaic_0001>

<bundles_post_ra>
// kernel: tpu_custom_call.1
= control target key start
LH: loop header
LB: loop body
LE: loop exit
PB: predicated region body
PF: predicated region fallthrough
CT: control target
= control target key end

     0   :  { %9 = vsyncpa [#allocation5], 0  ;;  %s170_s0 = inlined_call_operand.<no memory space> [shape: s32[1], index: 0, kind: input, shape index: {}]   ;;  %s171_s1 = inlined_call_operand.hbm [shape: f32[8,128], index: 1, kind: input, shape index: {}]   ;;  %s172_s2 = inlined_call_operand.hbm [shape: f32[2,8,128], index: 2, kind: input, shape index: {}]   ;;  %s173_s3 = inlined_call_operand.hbm [shape: f32[2,8,128], index: 3, kind: output, shape index: {}]  }
   0x1   :  { %10 = vsyncpa [#allocation8], 0 }
   0x2   :  { %11 = vsyncpa [#allocation6], 0  ;;  %s136_s12 = smov [#allocation4]   ;;  %s137_s14 = smov [#allocation7]  }
   0x3   :  { %s18_s13 = sshll.u32 %s136_s12, 4  ;;  %s27_s15 = sshll.u32 %s137_s14, 4  ;;  %s19_s13 = int_to_ptr.vmem [resolvable:$true] %s18_s13  ;;  %s28_s15 = int_to_ptr.vmem [resolvable:$true] %s27_s15 }
   0x4   :  { %s78_s16 = scalar_lea.vmem %s19_s13, 128  ;;  %p83_p1 = scmp.lt.s32.totalorder %s19_s13, %s19_s13 }
   0x5   :  { %p79_p0 = scmp.ne.s32.totalorder %s19_s13, %s78_s16  ;;  %p84_p2 = scmp.lt.s32.totalorder %s78_s16, %s78_s16 }
   0x7   :  { %p85_p3 = por %p84_p2, %p83_p1 }
   0x9   :  { %p86_p4 = pnand %p85_p3, %p79_p0 }
   0xb   :  { %89 = shalt.err (!%p86_p4)
}
   0xc   :  { %21 = dma.hbm_to_vmem [thread:$0]  %s171_s1, 128, %s19_s13, [#allocation5]  }
   0xd   :  { %s98_s18 = scalar_lea.vmem %s28_s15, 256  ;;  %p103_p6 = scmp.lt.s32.totalorder %s28_s15, %s28_s15 }
   0xe   :  { %p99_p5 = scmp.ne.s32.totalorder %s28_s15, %s98_s18  ;;  %p104_p7 = scmp.lt.s32.totalorder %s98_s18, %s98_s18 }
  0x10   :  { %p105_p8 = por %p104_p7, %p103_p6 }
  0x12   :  { %p106_p9 = pnand %p105_p8, %p99_p5 }
  0x14   :  { %109 = shalt.err (!%p106_p9)
}
  0x15   :  { %s138_s19 = smov 128   ;;  %s139_s20 = smov 8  }
  0x16   :  { %33 = dma.hbm_to_vmem [thread:$0]  %s172_s2, 256, %s28_s15, [#allocation8], %s138_s19, %s138_s19, %s139_s20  }
  0x17   :  { %130 = dma.done.wait [#allocation5], 128  }
  0x18   :  { %131 = vsyncadd [#allocation5], 4294967168 }
  0x19   :  { %132 = dma.done.wait [#allocation8], 256  }
  0x1a   :  { %133 = vsyncadd [#allocation8], 4294967040  ;;  %s140_s23 = smov [#allocation9]   ;;  %v40_v0 = vld [vmem:[#allocation7] sm:$0xff]  ;;  %v42_v1 = vld [vmem:[#allocation4] sm:$0xff] }
  0x1b   :  { %s52_s24 = sshll.u32 %s140_s23, 4  ;;  %v41_v2 = vld [vmem:[#allocation7 + $0x8] sm:$0xff]  ;;  %v43_v3 = vadd.f32 %v42_v1, %v40_v0  ;;  %s53_s24 = int_to_ptr.vmem [resolvable:$true] %s52_s24 }
  0x1c   :  { %v44_v4 = vadd.f32 %v42_v1, %v41_v2  ;;  %s110_s1 = scalar_lea.vmem %s53_s24, 256  ;;  %p115_p11 = scmp.lt.s32.totalorder %s53_s24, %s53_s24 }
  0x1d   :  { %45 = vst [vmem:[#allocation9] sm:$0xff] %v43_v3  ;;  %p111_p10 = scmp.ne.s32.totalorder %s53_s24, %s110_s1  ;;  %p116_p12 = scmp.lt.s32.totalorder %s110_s1, %s110_s1 }
  0x1e   :  { %46 = vst [vmem:[#allocation9 + $0x8] sm:$0xff] %v44_v4 }
  0x1f   :  { %p117_p13 = por %p116_p12, %p115_p11 }
  0x21   :  { %p118_p0 = pnand %p117_p13, %p111_p10 }
  0x23   :  { %121 = shalt.err (!%p118_p0)
}
  0x24   :  { %58 = dma.vmem_to_hbm [thread:$0]  %s53_s24, 256, %s173_s3, [#allocation6], %s138_s19, %s138_s19, %s139_s20  }
  0x25   :  { %134 = dma.done.wait [#allocation6], 256  }
  0x26   :  { %135 = vsyncadd [#allocation6], 4294967040 }
  0x27   :  { %62 = vsyncpa [#allocation5], 1 }
  0x28   :  { %63 = vsyncpa [#allocation8], 1 }
  0x29   :  { %64 = vsyncpa [#allocation6], 1 }

</bundles_post_ra>
